<compile_context>
chip_gen: v5e
topology: v5e:2x2
jax: 0.10.0
libtpu: 0.0.40
codegen_flags: <defaults>
</compile_context>

<pallas_src>
import functools

import jax
import jax.numpy as jnp
from jax import lax
from jax.experimental import pallas as pl
from jax.experimental.pallas import tpu as pltpu

LANE = 128       # fast (lane) axis
TM_MAX = 1024    # max rows per tile: (1024, 128) f32 block = 512 KiB
NCORES = 2       # leading "parallel" grid axis (v7x megacore; fine on 1-TC chips)


def _round_up(x, m):
    return ((x + m - 1) // m) * m


def _make_kernel(tm, spc, steps, n_valid, needs_mask):
    """Build the reduction kernel for a fixed (static) tiling."""

    def psum(x):
        # (tm, LANE) -> (8, LANE): tile-preserving reshape + add over the
        # leading (untiled) axis — pure VPU adds, no cross-lane/sublane work.
        return jnp.sum(x.reshape(tm // 8, 8, LANE), axis=0)

    def kernel(pr_ref, gt_ref, out_ref):
        c = pl.program_id(0)   # core slice ("parallel")
        i = pl.program_id(1)   # reduction step ("arbitrary")

        @pl.when(i == 0)
        def _():
            out_ref[...] = jnp.zeros_like(out_ref)

        pr = pr_ref[...].astype(jnp.float32)
        gt = gt_ref[...].astype(jnp.float32)

        if needs_mask:
            tile = c * spc + i  # nominal (unclamped) tile index
            row = lax.broadcasted_iota(jnp.int32, (tm, LANE), 0)
            lane = lax.broadcasted_iota(jnp.int32, (tm, LANE), 1)
            gidx = (tile * tm + row) * LANE + lane
            mask = gidx < n_valid
            # Zero the inputs in the invalid region (also kills any undefined
            # padding data before it reaches exp/log).
            pr = jnp.where(mask, pr, 0.0)
            gt = jnp.where(mask, gt, 0.0)

        p = jax.nn.sigmoid(pr)
        # Numerically-stable BCEWithLogits reusing p:
        #   max(x,0) - x*y + log1p(exp(-|x|)) == max(x,0) - x*y - log(max(p,1-p))
        bce = jnp.maximum(pr, 0.0) - pr * gt - jnp.log(jnp.maximum(p, 1.0 - p))

        if needs_mask:
            p_c = jnp.where(mask, p, 0.0)
            bce_c = jnp.where(mask, bce, 0.0)
        else:
            p_c, bce_c = p, bce

        # gt is already zero in the masked region, so gt * p needs no extra mask.
        out_ref[0, 0] += psum(gt * p)    # tp
        out_ref[0, 1] += psum(p_c)       # sum(sigmoid(pr))
        out_ref[0, 2] += psum(gt)        # sum(gt)
        out_ref[0, 3] += psum(bce_c)     # sum(bce)

    return kernel


@functools.partial(jax.jit, static_argnames=("eps", "lambda_dice", "lambda_bce"))
def bce_dice_loss(y_pr, y_gt, eps=1e-7, lambda_dice=1.0, lambda_bce=1.0):
    """Equivalent of BCEDiceLoss(activation='sigmoid').forward(y_pr, y_gt)."""
    n = y_pr.size

    pr = y_pr.reshape(-1)
    gt = y_gt.reshape(-1)

    # Only pad (tiny, <=127 elems) if the flat size is not a multiple of 128;
    # otherwise reshape is a pure view (no extra HBM traffic).
    lane_pad = (-n) % LANE
    if lane_pad:
        pr = jnp.pad(pr, (0, lane_pad))
        gt = jnp.pad(gt, (0, lane_pad))
    rows = (n + lane_pad) // LANE
    pr2d = pr.reshape(rows, LANE)
    gt2d = gt.reshape(rows, LANE)

    # Row tile: as big as possible up to TM_MAX, rounded to a multiple of 32
    # (dtype-agnostic sublane packing).
    tm = TM_MAX if rows >= TM_MAX else max(32, _round_up(rows, 32))
    steps = -(-rows // tm)              # total tiles
    spc = -(-steps // NCORES)           # tiles per core slice
    needs_mask = (NCORES * spc * tm * LANE) != n

    kernel = _make_kernel(tm, spc, steps, n, needs_mask)

    # Clamp overflow tiles (when steps doesn't split evenly across NCORES) back
    # onto the last valid tile; their contribution is masked out in-kernel.
    def in_map(c, i):
        return (jnp.minimum(c * spc + i, steps - 1), 0)

    parts = pl.pallas_call(
        kernel,
        out_shape=jax.ShapeDtypeStruct((NCORES, 4, 8, LANE), jnp.float32),
        grid=(NCORES, spc),
        in_specs=[
            pl.BlockSpec((tm, LANE), in_map),
            pl.BlockSpec((tm, LANE), in_map),
        ],
        out_specs=pl.BlockSpec((1, 4, 8, LANE), lambda c, i: (c, 0, 0, 0)),
        compiler_params=pltpu.CompilerParams(
            dimension_semantics=("parallel", "arbitrary")
        ),
    )(pr2d, gt2d)

    # Tiny final reduction + scalar combination in plain JAX.
    sums = jnp.sum(parts, axis=(0, 2, 3))  # (4,)
    tp, sum_p, sum_gt, sum_bce = sums[0], sums[1], sums[2], sums[3]

    fp = sum_p - tp
    fn = sum_gt - tp
    # beta = 1  =>  (1 + beta^2) = 2, beta^2 = 1
    score = (2.0 * tp + eps) / (2.0 * tp + fn + fp + eps)
    dice = 1.0 - score

    bce = sum_bce / jnp.float32(n)

    return lambda_dice * dice + lambda_bce * bce


def _reference(y_pr, y_gt, eps=1e-7):
    """Pure-JAX reference mirroring the PyTorch forward."""
    p = jax.nn.sigmoid(y_pr.astype(jnp.float32))
    gt = y_gt.astype(jnp.float32)
    tp = jnp.sum(gt * p)
    fp = jnp.sum(p) - tp
    fn = jnp.sum(gt) - tp
    score = (2.0 * tp + eps) / (2.0 * tp + fn + fp + eps)
    dice = 1.0 - score
    x = y_pr.astype(jnp.float32)
    bce = jnp.mean(jnp.maximum(x, 0.0) - x * gt + jnp.log1p(jnp.exp(-jnp.abs(x))))
    return dice + bce


if __name__ == "__main__":
    key = jax.random.PRNGKey(0)
    k1, k2 = jax.random.split(key)

    # NCHW inputs, as in the PyTorch module: logits and binary targets.
    B, C, H, W = 2, 4, 16, 16
    y_pr = jax.random.normal(k1, (B, C, H, W), dtype=jnp.float32)
    y_gt = (jax.random.uniform(k2, (B, C, H, W)) > 0.5).astype(jnp.float32)

    loss = jax.block_until_ready(bce_dice_loss(y_pr, y_gt))
    ref = jax.block_until_ready(_reference(y_pr, y_gt))
    assert jnp.allclose(loss, ref, rtol=1e-5, atol=1e-5), (loss, ref)

    print("KERNEL_OK")
</pallas_src>

<mosaic_0001>
module attributes {stable_mosaic.version = 11 : i64} {
  func.func @kernel(%arg0: i32, %arg1: i32, %arg2: memref<32x128xf32, #tpu.memory_space<vmem>>, %arg3: memref<32x128xf32, #tpu.memory_space<vmem>>, %arg4: memref<1x4x8x128xf32, #tpu.memory_space<vmem>>) attributes {dimension_semantics = [#tpu.dimension_semantics<parallel>, #tpu.dimension_semantics<arbitrary>], iteration_bounds = array<i64: 2, 1>, scalar_prefetch = 0 : i64, scratch_operands = 0 : i64, tpu.core_type = #tpu.core_type<tc>, window_params = [{transform_indices = @transform_0, window_bounds = array<i64: 32, 128>}, {transform_indices = @transform_1, window_bounds = array<i64: 32, 128>}, {transform_indices = @transform_2, window_bounds = array<i64: 1, 4, 8, 128>}]} {
    %c0_i32 = arith.constant 0 : i32
    %0 = arith.cmpi eq, %arg1, %c0_i32 : i32
    %1 = arith.extui %0 : i1 to i32
    %c0_i32_0 = arith.constant 0 : i32
    %2 = arith.cmpi ne, %1, %c0_i32_0 : i32
    scf.if %2 {
      %cst_43 = arith.constant 0.000000e+00 : f32
      %72 = vector.broadcast %cst_43 : f32 to vector<1x4x8x128xf32>
      %c0_44 = arith.constant 0 : index
      %c0_45 = arith.constant 0 : index
      %c0_46 = arith.constant 0 : index
      %c0_47 = arith.constant 0 : index
      %73 = vector.load %arg4[%c0_44, %c0_45, %c0_46, %c0_47] : memref<1x4x8x128xf32, #tpu.memory_space<vmem>>, vector<1x4x8x128xf32>
      tpu.vector_store %arg4[%c0_44, %c0_45, %c0_46, %c0_47], %72 {strides = array<i32>} : memref<1x4x8x128xf32, #tpu.memory_space<vmem>>, vector<1x4x8x128xf32>,
    } else {
    }
    %c0 = arith.constant 0 : index
    %c0_1 = arith.constant 0 : index
    %3 = vector.load %arg2[%c0, %c0_1] : memref<32x128xf32, #tpu.memory_space<vmem>>, vector<32x128xf32>
    %c0_2 = arith.constant 0 : index
    %c0_3 = arith.constant 0 : index
    %4 = vector.load %arg3[%c0_2, %c0_3] : memref<32x128xf32, #tpu.memory_space<vmem>>, vector<32x128xf32>
    %c1_i32 = arith.constant 1 : i32
    %5 = arith.muli %arg0, %c1_i32 : i32
    %6 = arith.addi %5, %arg1 : i32
    %7 = tpu.iota {dimensions = array<i32: 0>} : vector<32x128xi32>
    %8 = tpu.iota {dimensions = array<i32: 1>} : vector<32x128xi32>
    %c32_i32 = arith.constant 32 : i32
    %9 = arith.muli %6, %c32_i32 : i32
    %10 = vector.broadcast %9 : i32 to vector<32x128xi32>
    %11 = arith.addi %10, %7 : vector<32x128xi32>
    %c128_i32 = arith.constant 128 : i32
    %12 = vector.broadcast %c128_i32 : i32 to vector<32x128xi32>
    %13 = arith.muli %11, %12 : vector<32x128xi32>
    %14 = arith.addi %13, %8 : vector<32x128xi32>
    %c2048_i32 = arith.constant 2048 : i32
    %15 = vector.broadcast %c2048_i32 : i32 to vector<32x128xi32>
    %16 = arith.cmpi slt, %14, %15 : vector<32x128xi32>
    %cst = arith.constant 0.000000e+00 : f32
    %17 = vector.broadcast %cst : f32 to vector<32x128xf32>
    %18 = arith.select %16, %3, %17 : vector<32x128xi1>, vector<32x128xf32>
    %cst_4 = arith.constant 0.000000e+00 : f32
    %19 = vector.broadcast %cst_4 : f32 to vector<32x128xf32>
    %20 = arith.select %16, %4, %19 : vector<32x128xi1>, vector<32x128xf32>
    %21 = arith.negf %18 : vector<32x128xf32>
    %22 = math.exp %21 : vector<32x128xf32>
    %cst_5 = arith.constant 1.000000e+00 : f32
    %23 = vector.broadcast %cst_5 : f32 to vector<32x128xf32>
    %24 = arith.addf %23, %22 : vector<32x128xf32>
    %25 = arith.divf %23, %24 : vector<32x128xf32>
    %cst_6 = arith.constant 0.000000e+00 : f32
    %26 = vector.broadcast %cst_6 : f32 to vector<32x128xf32>
    %27 = arith.maximumf %18, %26 : vector<32x128xf32>
    %28 = arith.mulf %18, %20 : vector<32x128xf32>
    %29 = arith.subf %27, %28 : vector<32x128xf32>
    %cst_7 = arith.constant 1.000000e+00 : f32
    %30 = vector.broadcast %cst_7 : f32 to vector<32x128xf32>
    %31 = arith.subf %30, %25 : vector<32x128xf32>
    %32 = arith.maximumf %25, %31 : vector<32x128xf32>
    %33 = math.log %32 : vector<32x128xf32>
    %34 = arith.subf %29, %33 : vector<32x128xf32>
    %cst_8 = arith.constant 0.000000e+00 : f32
    %35 = vector.broadcast %cst_8 : f32 to vector<32x128xf32>
    %36 = arith.select %16, %25, %35 : vector<32x128xi1>, vector<32x128xf32>
    %cst_9 = arith.constant 0.000000e+00 : f32
    %37 = vector.broadcast %cst_9 : f32 to vector<32x128xf32>
    %38 = arith.select %16, %34, %37 : vector<32x128xi1>, vector<32x128xf32>
    %c0_10 = arith.constant 0 : index
    %c0_11 = arith.constant 0 : index
    %c0_12 = arith.constant 0 : index
    %c0_13 = arith.constant 0 : index
    %39 = vector.load %arg4[%c0_10, %c0_11, %c0_12, %c0_13] : memref<1x4x8x128xf32, #tpu.memory_space<vmem>>, vector<1x1x8x128xf32>
    %40 = vector.shape_cast %39 : vector<1x1x8x128xf32> to vector<8x128xf32>
    %41 = arith.mulf %20, %25 : vector<32x128xf32>
    %42 = vector.shape_cast %41 : vector<32x128xf32> to vector<4x8x128xf32>
    %cst_14 = arith.constant dense<0.000000e+00> : vector<8x128xf32>
    %43 = vector.multi_reduction <add>, %42, %cst_14 [0] : vector<4x8x128xf32> to vector<8x128xf32>
    %44 = arith.addf %40, %43 : vector<8x128xf32>
    %c0_15 = arith.constant 0 : index
    %c0_16 = arith.constant 0 : index
    %c0_17 = arith.constant 0 : index
    %c0_18 = arith.constant 0 : index
    %45 = vector.load %arg4[%c0_15, %c0_16, %c0_17, %c0_18] : memref<1x4x8x128xf32, #tpu.memory_space<vmem>>, vector<1x1x8x128xf32>
    %46 = vector.shape_cast %45 : vector<1x1x8x128xf32> to vector<8x128xf32>
    %47 = vector.shape_cast %44 : vector<8x128xf32> to vector<1x1x8x128xf32>
    tpu.vector_store %arg4[%c0_15, %c0_16, %c0_17, %c0_18], %47 {strides = array<i32>} : memref<1x4x8x128xf32, #tpu.memory_space<vmem>>, vector<1x1x8x128xf32>,
    %c0_19 = arith.constant 0 : index
    %c1 = arith.constant 1 : index
    %c0_20 = arith.constant 0 : index
    %c0_21 = arith.constant 0 : index
    %48 = vector.load %arg4[%c0_19, %c1, %c0_20, %c0_21] : memref<1x4x8x128xf32, #tpu.memory_space<vmem>>, vector<1x1x8x128xf32>
    %49 = vector.shape_cast %48 : vector<1x1x8x128xf32> to vector<8x128xf32>
    %50 = vector.shape_cast %36 : vector<32x128xf32> to vector<4x8x128xf32>
    %cst_22 = arith.constant dense<0.000000e+00> : vector<8x128xf32>
    %51 = vector.multi_reduction <add>, %50, %cst_22 [0] : vector<4x8x128xf32> to vector<8x128xf32>
    %52 = arith.addf %49, %51 : vector<8x128xf32>
    %c0_23 = arith.constant 0 : index
    %c1_24 = arith.constant 1 : index
    %c0_25 = arith.constant 0 : index
    %c0_26 = arith.constant 0 : index
    %53 = vector.load %arg4[%c0_23, %c1_24, %c0_25, %c0_26] : memref<1x4x8x128xf32, #tpu.memory_space<vmem>>, vector<1x1x8x128xf32>
    %54 = vector.shape_cast %53 : vector<1x1x8x128xf32> to vector<8x128xf32>
    %55 = vector.shape_cast %52 : vector<8x128xf32> to vector<1x1x8x128xf32>
    tpu.vector_store %arg4[%c0_23, %c1_24, %c0_25, %c0_26], %55 {strides = array<i32>} : memref<1x4x8x128xf32, #tpu.memory_space<vmem>>, vector<1x1x8x128xf32>,
    %c0_27 = arith.constant 0 : index
    %c2 = arith.constant 2 : index
    %c0_28 = arith.constant 0 : index
    %c0_29 = arith.constant 0 : index
    %56 = vector.load %arg4[%c0_27, %c2, %c0_28, %c0_29] : memref<1x4x8x128xf32, #tpu.memory_space<vmem>>, vector<1x1x8x128xf32>
    %57 = vector.shape_cast %56 : vector<1x1x8x128xf32> to vector<8x128xf32>
    %58 = vector.shape_cast %20 : vector<32x128xf32> to vector<4x8x128xf32>
    %cst_30 = arith.constant dense<0.000000e+00> : vector<8x128xf32>
    %59 = vector.multi_reduction <add>, %58, %cst_30 [0] : vector<4x8x128xf32> to vector<8x128xf32>
    %60 = arith.addf %57, %59 : vector<8x128xf32>
    %c0_31 = arith.constant 0 : index
    %c2_32 = arith.constant 2 : index
    %c0_33 = arith.constant 0 : index
    %c0_34 = arith.constant 0 : index
    %61 = vector.load %arg4[%c0_31, %c2_32, %c0_33, %c0_34] : memref<1x4x8x128xf32, #tpu.memory_space<vmem>>, vector<1x1x8x128xf32>
    %62 = vector.shape_cast %61 : vector<1x1x8x128xf32> to vector<8x128xf32>
    %63 = vector.shape_cast %60 : vector<8x128xf32> to vector<1x1x8x128xf32>
    tpu.vector_store %arg4[%c0_31, %c2_32, %c0_33, %c0_34], %63 {strides = array<i32>} : memref<1x4x8x128xf32, #tpu.memory_space<vmem>>, vector<1x1x8x128xf32>,
    %c0_35 = arith.constant 0 : index
    %c3 = arith.constant 3 : index
    %c0_36 = arith.constant 0 : index
    %c0_37 = arith.constant 0 : index
    %64 = vector.load %arg4[%c0_35, %c3, %c0_36, %c0_37] : memref<1x4x8x128xf32, #tpu.memory_space<vmem>>, vector<1x1x8x128xf32>
    %65 = vector.shape_cast %64 : vector<1x1x8x128xf32> to vector<8x128xf32>
    %66 = vector.shape_cast %38 : vector<32x128xf32> to vector<4x8x128xf32>
    %cst_38 = arith.constant dense<0.000000e+00> : vector<8x128xf32>
    %67 = vector.multi_reduction <add>, %66, %cst_38 [0] : vector<4x8x128xf32> to vector<8x128xf32>
    %68 = arith.addf %65, %67 : vector<8x128xf32>
    %c0_39 = arith.constant 0 : index
    %c3_40 = arith.constant 3 : index
    %c0_41 = arith.constant 0 : index
    %c0_42 = arith.constant 0 : index
    %69 = vector.load %arg4[%c0_39, %c3_40, %c0_41, %c0_42] : memref<1x4x8x128xf32, #tpu.memory_space<vmem>>, vector<1x1x8x128xf32>
    %70 = vector.shape_cast %69 : vector<1x1x8x128xf32> to vector<8x128xf32>
    %71 = vector.shape_cast %68 : vector<8x128xf32> to vector<1x1x8x128xf32>
    tpu.vector_store %arg4[%c0_39, %c3_40, %c0_41, %c0_42], %71 {strides = array<i32>} : memref<1x4x8x128xf32, #tpu.memory_space<vmem>>, vector<1x1x8x128xf32>,
    return
  }
  func.func @transform_0(%arg0: i32, %arg1: i32) -> (i32, i32) {
    %c1_i32 = arith.constant 1 : i32
    %0 = arith.muli %arg0, %c1_i32 : i32
    %1 = arith.addi %0, %arg1 : i32
    %c0_i32 = arith.constant 0 : i32
    %2 = arith.minsi %1, %c0_i32 : i32
    %c0_i32_0 = arith.constant 0 : i32
    %c0_i32_1 = arith.constant 0 : i32
    return %2, %c0_i32_0 : i32, i32
  }
  func.func @transform_1(%arg0: i32, %arg1: i32) -> (i32, i32) {
    %c1_i32 = arith.constant 1 : i32
    %0 = arith.muli %arg0, %c1_i32 : i32
    %1 = arith.addi %0, %arg1 : i32
    %c0_i32 = arith.constant 0 : i32
    %2 = arith.minsi %1, %c0_i32 : i32
    %c0_i32_0 = arith.constant 0 : i32
    %c0_i32_1 = arith.constant 0 : i32
    return %2, %c0_i32_0 : i32, i32
  }
  func.func @transform_2(%arg0: i32, %arg1: i32) -> (i32, i32, i32, i32) {
    %c0_i32 = arith.constant 0 : i32
    %c0_i32_0 = arith.constant 0 : i32
    %c0_i32_1 = arith.constant 0 : i32
    %c0_i32_2 = arith.constant 0 : i32
    return %arg0, %c0_i32, %c0_i32_0, %c0_i32_1 : i32, i32, i32, i32
  }
}

</mosaic_0001>

<bundles_post_ra>
// kernel: bce_dice_loss.1
= control target key start
LH: loop header
LB: loop body
LE: loop exit
PB: predicated region body
PF: predicated region fallthrough
CT: control target
= control target key end

     0   :  { %s627_s9 = smov 0   ;;  %s629_s10 = smov 0   ;;  %s794_s0 = inlined_call_operand.vmem [shape: f32[16,128], index: 0, kind: input, shape index: {}]   ;;  %s795_s1 = inlined_call_operand.vmem [shape: f32[16,128], index: 1, kind: input, shape index: {}]   ;;  %s796_s2 = inlined_call_operand.vmem [shape: f32[2,4,8,128], index: 2, kind: output, shape index: {}]  }
   0x1   :  { %s631_s11 = smov 0  }
   0x2 LB: > { %s24_s12 = sadd.s32 1, %s606_s10  ;;  %p518_p0 = scmp.ge.s32.totalorder %s610_s11, 1  ;;  %s610_s11 = sphi %s631_s11, %s12_s11   ;;  %s606_s10 = sphi %s629_s10, %s808_s10   ;;  %s602_s9 = sphi %s627_s9, %s807_s9  }
   0x3   : > { %p26_p1 = scmp.ge.s32.totalorder %s24_s12, 2  ;;  %p168_p2 = scmp.lt.s32.totalorder %s610_s11, 3 }
   0x5   : > { %s810_s12 = smov (%p26_p1, %s24_s12), 0  ;;  %p169_p3 = pnand %p518_p0, %p168_p2 }
   0x6   : > { %p206_p4 = scmp.lt.s32.totalorder (!%p169_p3), %s602_s9, 0  ;;  %s525_s13 = sshll.u32 (!%p169_p3), %s602_s9, 5 }
   0x7   : > { %172 = sbr.rel (%p169_p3) target bundleno = 79 (0x4f), region = 28  ;;  %p237_p6 = scmp.lt.s32.totalorder (!%p169_p3), %s602_s9, 1 }
   0xc   : > { %v259_v0 = vlaneseq  ;;  %v267_v2 = vstv %s525_s13  ;;  %s207_s14 = scalar_select %p206_p4, %s602_s9, 0 }
   0xd   : > { %s814_s9 = smov (!%p237_p6, %s602_s9), 1 }
   0xe   : > { %v260_v1 = vshrl.u32 %v259_v0, 7  ;;  %v265_v3 = vand.u32 127, %v259_v0  ;;  %s519_s15 = sshll.u32 %s207_s14, 2  ;;  %s538_s23 = sshll.u32 %s814_s9, 5 }
   0xf   : > { %p211_p5 = scmp.lt.s32.totalorder %s519_s15, 1  ;;  %s713_s26 = scalar_lea.vmem %s796_s2, %s538_s23 }
  0x10   : > { %v261_v4 = vadd.s32 8, %v260_v1  ;;  %v262_v5 = vadd.s32 16, %v260_v1  ;;  %v263_v6 = vadd.s32 24, %v260_v1  ;;  %v268_v7 = vadd.s32 %v267_v2, %v260_v1 }
  0x11   : > { %s812_s15 = smov (!%p211_p5, %s519_s15), 1 }
  0x12   : > { %v269_v8 = vadd.s32 %v267_v2, %v261_v4  ;;  %v270_v9 = vadd.s32 %v267_v2, %v262_v5  ;;  %v271_v10 = vadd.s32 %v267_v2, %v263_v6  ;;  %v272_v11 = vmul.u32 128, %v268_v7  ;;  %s520_s16 = sshll.u32 %s812_s15, 3 }
  0x13   : > { %s214_s19 = scalar_lea.vmem %s794_s0, %s520_s16  ;;  %s230_s22 = scalar_lea.vmem %s795_s1, %s520_s16 }
  0x14   : > { %v273_v12 = vmul.u32 128, %v269_v8  ;;  %v274_v13 = vmul.u32 128, %v270_v9  ;;  %v275_v14 = vmul.u32 128, %v271_v10  ;;  %v650_v15 = vadd.s32 %v272_v11, %v265_v3  ;;  %v250_v19 = vld [vmem:[%s214_s19] sm:$0xff]  ;;  %v251_v20 = vld [vmem:[%s214_s19 + $0x8] sm:$0xff]  ;;  %v252_v21 = vld [vmem:[%s214_s19 + $0x10] sm:$0xff] }
  0x15   : > { %v253_v22 = vld [vmem:[%s214_s19 + $0x18] sm:$0xff]  ;;  %v254_v31 = vld [vmem:[%s230_s22] sm:$0xff]  ;;  %v255_v32 = vld [vmem:[%s230_s22 + $0x8] sm:$0xff] }
  0x16   : > { %v652_v16 = vadd.s32 %v273_v12, %v265_v3  ;;  %v654_v17 = vadd.s32 %v274_v13, %v265_v3  ;;  %v656_v18 = vadd.s32 %v275_v14, %v265_v3  ;;  %vm280_vm0 = vcmp.lt.s32.totalorder %v650_v15, 2048  ;;  %v256_v37 = vld [vmem:[%s230_s22 + $0x10] sm:$0xff]  ;;  %v257_v46 = vld [vmem:[%s230_s22 + $0x18] sm:$0xff] }
  0x17   : > { %v667_v23 = vsel %vm280_vm0, %v250_v19, 0.0  ;;  %v691_v34 = vsel %vm280_vm0, %v254_v31, 0.0 }
  0x18   : > { %vm281_vm1 = vcmp.lt.s32.totalorder %v652_v16, 2048  ;;  %vm282_vm2 = vcmp.lt.s32.totalorder %v654_v17, 2048  ;;  %vm283_vm3 = vcmp.lt.s32.totalorder %v656_v18, 2048  ;;  %v526_v27 = vmul.f32 -1.442695, %v667_v23 }
  0x19   : > { %v671_v24 = vsel %vm281_vm1, %v251_v20, 0.0  ;;  %v675_v25 = vsel %vm282_vm2, %v252_v21, 0.0  ;;  %v679_v26 = vsel %vm283_vm3, %v253_v22, 0.0  ;;  %v695_v35 = vsel %vm281_vm1, %v255_v32, 0.0 }
  0x1a   : > { %v527_v28 = vmul.f32 -1.442695, %v671_v24  ;;  %v528_v29 = vmul.f32 -1.442695, %v675_v25  ;;  %v529_v30 = vmul.f32 -1.442695, %v679_v26  ;;  %564 = vpow2.f32 %v526_v27 }
  0x1b   : > { %v427_v39 = vadd.f32 %v695_v35, %v691_v34  ;;  %v702_v44 = vsel %vm282_vm2, %v256_v37, 0.0  ;;  %v707_v50 = vsel %vm283_vm3, %v257_v46, 0.0 }
  0x1c   : > { %566 = vpow2.f32 %v527_v28  ;;  %v375_v7 = vmul.f32 %v707_v50, %v679_v26 }
  0x1d   : > { %568 = vpow2.f32 %v528_v29  ;;  %v428_v47 = vadd.f32 %v427_v39, %v702_v44 }
  0x1e   : > { %570 = vpow2.f32 %v529_v30 }
  0x1f   : > { %v429_v53 = vadd.f32 %v428_v47, %v707_v50 }
  0x20   : > { %v565_v33 = vpop.eup %564 }
  0x21   : > { %v304_v38 = vadd.f32 1.0, %v565_v33  ;;  %533 = vst [vmem:[%s713_s26 + $0x10] sm:$0xff] %v429_v53 }
  0x22   : > { %v567_v36 = vpop.eup %566 }
  0x23   : > { %v569_v40 = vpop.eup %568  ;;  %v305_v41 = vadd.f32 1.0, %v567_v36  ;;  %572 = vrcp.f32 %v304_v38  ;;  %v317_v48 = vand.u32 2147483647, %v304_v38  ;;  %v319_v49 = vand.u32 2147483648, %v304_v38 }
  0x24   : > { %v571_v42 = vpop.eup %570  ;;  %v306_v43 = vadd.f32 1.0, %v569_v40  ;;  %vm313_vm4 = vweird.f32 %v304_v38 }
  0x25   : > { %v307_v45 = vadd.f32 1.0, %v571_v42  ;;  %574 = vrcp.f32 %v305_v41  ;;  %v334_v52 = vand.u32 2147483648, %v305_v41  ;;  %vm715_vm5 = vcmp.eq.f32.partialorder %v317_v48, 8.507059e+37 }
  0x26   : > { %576 = vrcp.f32 %v306_v43  ;;  %vm328_vm6 = vweird.f32 %v305_v41  ;;  %v332_v57 = vand.u32 2147483647, %v305_v41  ;;  %v320_v59 = vor.u32 1.1754944e-38, %v319_v49 }
  0x27   : > { %578 = vrcp.f32 %v307_v45  ;;  %vm343_vm7 = vweird.f32 %v306_v43  ;;  %v347_v63 = vand.u32 2147483647, %v306_v43  ;;  %v335_v2 = vor.u32 1.1754944e-38, %v334_v52 }
  0x28   : > { %v349_v3 = vand.u32 2147483648, %v306_v43  ;;  %vm358_vm12 = vweird.f32 %v307_v45  ;;  %v362_v9 = vand.u32 2147483647, %v307_v45  ;;  %v364_v10 = vand.u32 2147483648, %v307_v45 }
  0x29   : > { %v573_v51 = vpop.eup %572  ;;  %vm333_vm15 = vcmp.eq.f32.partialorder %v332_v57, 8.507059e+37 }
  0x2a   : > { %v309_v55 = vmul.f32 %v573_v51, %v304_v38  ;;  %vm314_vm8 = vweird.f32 %v573_v51  ;;  %v350_v21 = vor.u32 1.1754944e-38, %v349_v3  ;;  %v365_v32 = vor.u32 1.1754944e-38, %v364_v10 }
  0x2b   : > { %v575_v54 = vpop.eup %574  ;;  %vm721_vm11 = vmor %vm313_vm4, %vm314_vm8  ;;  %vm348_vm8 = vcmp.eq.f32.partialorder %v347_v63, 8.507059e+37  ;;  %v373_v3 = vmul.f32 %v695_v35, %v671_v24 }
  0x2c   : > { %v577_v58 = vpop.eup %576  ;;  %v324_v60 = vmul.f32 %v575_v54, %v305_v41  ;;  %v310_v61 = vsub.f32 1.0, %v309_v55  ;;  %vm329_vm9 = vweird.f32 %v575_v54 }
  0x2d   : > { %v339_v62 = vmul.f32 %v577_v58, %v306_v43  ;;  %v579_v0 = vpop.eup %578  ;;  %vm344_vm10 = vweird.f32 %v577_v58  ;;  %vm726_vm13 = vmor %vm328_vm6, %vm329_vm9 }
  0x2e   : > { %v325_v1 = vsub.f32 1.0, %v324_v60  ;;  %v311_v4 = vmul.f32 %v573_v51, %v310_v61  ;;  %v354_v6 = vmul.f32 %v579_v0, %v307_v45  ;;  %vm359_vm14 = vweird.f32 %v579_v0  ;;  %vm731_vm4 = vmor %vm343_vm7, %vm344_vm10 }
  0x2f   : > { %v340_v5 = vsub.f32 1.0, %v339_v62  ;;  %vm742_vm6 = vmor %vm358_vm12, %vm359_vm14  ;;  %vm363_vm7 = vcmp.eq.f32.partialorder %v362_v9, 8.507059e+37 }
  0x30   : > { %v326_v8 = vmul.f32 %v575_v54, %v325_v1  ;;  %v312_v11 = vadd.f32 %v573_v51, %v311_v4  ;;  %v355_v14 = vsub.f32 1.0, %v354_v6  ;;  %v372_v1 = vmul.f32 %v691_v34, %v667_v23 }
  0x31   : > { %v341_v13 = vmul.f32 %v577_v58, %v340_v5  ;;  %v369_v4 = vmax.f32 %v671_v24, 0.0  ;;  %v374_v5 = vmul.f32 %v702_v44, %v675_v25  ;;  %v370_v6 = vmax.f32 %v675_v25, 0.0 }
  0x32   : > { %v327_v19 = vadd.f32 %v575_v54, %v326_v8  ;;  %v316_v22 = vsel %vm721_vm11, %v573_v51, %v312_v11  ;;  %v356_v28 = vmul.f32 %v579_v0, %v355_v14 }
  0x33   : > { %v342_v27 = vadd.f32 %v577_v58, %v341_v13  ;;  %v321_v29 = vsel %vm715_vm5, %v320_v59, %v316_v22  ;;  %v377_v9 = vsub.f32 %v369_v4, %v373_v3  ;;  %v378_v10 = vsub.f32 %v370_v6, %v374_v5 }
  0x34   : > { %v331_v30 = vsel %vm726_vm13, %v575_v54, %v327_v19  ;;  %v357_v37 = vadd.f32 %v579_v0, %v356_v28  ;;  %v409_v38 = vmul.f32 %v321_v29, %v691_v34  ;;  %v400_v41 = vsel %vm280_vm0, %v321_v29, 0.0 }
  0x35   : > { %v336_v33 = vsel %vm333_vm15, %v335_v2, %v331_v30  ;;  %v346_v36 = vsel %vm731_vm4, %v577_v58, %v342_v27  ;;  %v380_v51 = vsub.f32 1.0, %v321_v29  ;;  %v368_v2 = vmax.f32 %v667_v23, 0.0 }
  0x36   : > { %v351_v39 = vsel %vm348_vm8, %v350_v21, %v346_v36  ;;  %v410_v40 = vmul.f32 %v336_v33, %v695_v35  ;;  %v401_v42 = vsel %vm281_vm1, %v336_v33, 0.0  ;;  %v361_v43 = vsel %vm742_vm6, %v579_v0, %v357_v37 }
  0x37   : > { %v411_v45 = vmul.f32 %v351_v39, %v702_v44  ;;  %v402_v46 = vsel %vm282_vm2, %v351_v39, 0.0  ;;  %v420_v47 = vadd.f32 %v401_v42, %v400_v41  ;;  %v366_v48 = vsel %vm363_vm7, %v365_v32, %v361_v43 }
  0x38   : > { %v413_v49 = vadd.f32 %v410_v40, %v409_v38  ;;  %v381_v52 = vsub.f32 1.0, %v336_v33  ;;  %v412_v53 = vmul.f32 %v366_v48, %v707_v50  ;;  %v403_v54 = vsel %vm283_vm3, %v366_v48, 0.0 }
  0x39   : > { %v421_v55 = vadd.f32 %v420_v47, %v402_v46  ;;  %v382_v56 = vsub.f32 1.0, %v351_v39  ;;  %v383_v58 = vsub.f32 1.0, %v366_v48  ;;  %v384_v59 = vmax.f32 %v321_v29, %v380_v51 }
  0x3a   : > { %v414_v57 = vadd.f32 %v413_v49, %v411_v45  ;;  %v385_v60 = vmax.f32 %v336_v33, %v381_v52  ;;  %v371_v23 = vmax.f32 %v679_v26, 0.0  ;;  %v376_v34 = vsub.f32 %v368_v2, %v372_v1 }
  0x3b   : > { %v422_v61 = vadd.f32 %v421_v55, %v403_v54  ;;  %v386_v62 = vmax.f32 %v351_v39, %v382_v56  ;;  %v387_v0 = vmax.f32 %v366_v48, %v383_v58  ;;  %580 = vlog2.f32 %v384_v59 }
  0x3c   : > { %v415_v63 = vadd.f32 %v414_v57, %v412_v53  ;;  %582 = vlog2.f32 %v385_v60  ;;  %v379_v12 = vsub.f32 %v371_v23, %v375_v7 }
  0x3d   : > { %584 = vlog2.f32 %v386_v62  ;;  %531 = vst [vmem:[%s713_s26 + $0x8] sm:$0xff] %v422_v61 }
  0x3e   : > { %586 = vlog2.f32 %v387_v0  ;;  %417 = vst [vmem:[%s713_s26] sm:$0xff] %v415_v63 }
  0x41   : > { %v581_v8 = vpop.eup %580 }
  0x42   : > { %v583_v35 = vpop.eup %582  ;;  %v389_v24 = vmul.f32 0.6931472, %v581_v8 }
  0x43   : > { %v585_v11 = vpop.eup %584  ;;  %v391_v44 = vmul.f32 0.6931472, %v583_v35 }
  0x44   : > { %v587_v13 = vpop.eup %586  ;;  %v393_v14 = vmul.f32 0.6931472, %v585_v11  ;;  %v396_v25 = vsub.f32 %v376_v34, %v389_v24 }
  0x45   : > { %v395_v19 = vmul.f32 0.6931472, %v587_v13  ;;  %v397_v20 = vsub.f32 %v377_v9, %v391_v44 }
  0x46   : > { %v398_v21 = vsub.f32 %v378_v10, %v393_v14  ;;  %v404_v50 = vsel %vm280_vm0, %v396_v25, 0.0 }
  0x47   : > { %v399_v26 = vsub.f32 %v379_v12, %v395_v19  ;;  %v405_v22 = vsel %vm281_vm1, %v397_v20, 0.0 }
  0x48   : > { %v406_v27 = vsel %vm282_vm2, %v398_v21, 0.0  ;;  %v434_v28 = vadd.f32 %v405_v22, %v404_v50 }
  0x49   : > { %v407_v29 = vsel %vm283_vm3, %v399_v26, 0.0 }
  0x4a   : > { %v435_v30 = vadd.f32 %v434_v28, %v406_v27 }
  0x4c   : > { %v436_v31 = vadd.f32 %v435_v30, %v407_v29 }
  0x4e   : > { %535 = vst [vmem:[%s713_s26 + $0x18] sm:$0xff] %v436_v31 }
  0x4f PF: > { %s12_s11 = sadd.s32 1, %s610_s11   ;;  %s807_s9 = smov %s606_s10 }
  0x50   : > { %p9_p7 = scmp.ge.s32.totalorder %s12_s11, 4   ;;  %s808_s10 = smov %s810_s12 }
  0x52   :  { %11 = sbr.rel (!%p9_p7) target bundleno = 2 (0x2), region = 68 }

</bundles_post_ra>
